<compile_context>
chip_gen: v7x
topology: tpu7x:2x2x1
jax: 0.10.0
libtpu: 0.0.40
codegen_flags: <defaults>
</compile_context>

<pallas_src>
import jax
import jax.numpy as jnp
from jax import lax
from jax.experimental import pallas as pl
from jax.experimental.pallas import tpu as pltpu

_MiB = 1024 * 1024


# ---------------------------------------------------------------------------
# Kernels
# ---------------------------------------------------------------------------
def _sae_kernel_f32_out(x_ref, we_ref, wdt_ref, recon_ref, code_ref):
    """float32-output variant: accumulate directly into the resident recon block."""
    d = pl.program_id(1)

    @pl.when(d == 0)
    def _init():
        recon_ref[...] = jnp.zeros_like(recon_ref)

    # Encoder: code = x @ W_enc.T  (contract the shared input_dim; native NT MXU path,
    # no transposed encoder-weight copy is ever materialized in HBM).
    code = lax.dot_general(
        x_ref[...], we_ref[...],
        dimension_numbers=(((1,), (1,)), ((), ())),
        preferred_element_type=jnp.float32)
    code_ref[...] = code.astype(code_ref.dtype)

    # Decoder partial sum: recon += code @ W_dec.T, with W_dec.T pre-materialized in
    # HBM so this is a plain NN matmul (contiguous row-slab DMA, bare vmatmul).
    recon_ref[...] += jnp.dot(
        code.astype(wdt_ref.dtype), wdt_ref[...],
        preferred_element_type=jnp.float32)


def _sae_kernel_acc_scratch(x_ref, we_ref, wdt_ref, recon_ref, code_ref, acc_ref):
    """Narrow-output (e.g. bf16) variant: f32 VMEM accumulator, cast at the end."""
    d = pl.program_id(1)

    @pl.when(d == 0)
    def _init():
        acc_ref[...] = jnp.zeros_like(acc_ref)

    code = lax.dot_general(
        x_ref[...], we_ref[...],
        dimension_numbers=(((1,), (1,)), ((), ())),
        preferred_element_type=jnp.float32)
    code_ref[...] = code.astype(code_ref.dtype)

    acc_ref[...] += jnp.dot(
        code.astype(wdt_ref.dtype), wdt_ref[...],
        preferred_element_type=jnp.float32)

    @pl.when(d == pl.num_programs(1) - 1)
    def _finalize():
        recon_ref[...] = acc_ref[...].astype(recon_ref.dtype)


# ---------------------------------------------------------------------------
# Device introspection & tile selection
# ---------------------------------------------------------------------------
def _round_up(x, m):
    return (x + m - 1) // m * m


def _sublane(dtype):
    itemsize = jnp.dtype(dtype).itemsize
    return {4: 8, 2: 16, 1: 32}.get(itemsize, 8)


def _device_kind():
    try:
        return jax.devices()[0].device_kind.lower()
    except Exception:
        return ""


def _vmem_capacity_bytes(kind):
    get_info = getattr(pltpu, "get_tpu_info", None)
    if get_info is not None:
        try:
            cap = int(get_info().vmem_capacity_bytes)
            if cap > 0:
                return cap
        except Exception:
            pass
    if "v7" in kind:
        return 64 * _MiB       # per-TensorCore on v7x
    if ("v5" in kind) or ("v6" in kind):
        return 128 * _MiB
    return 64 * _MiB           # conservative default when detection fails


def _budget_and_limit(kind):
    cap = _vmem_capacity_bytes(kind)
    if "v7" in kind or cap < 100 * _MiB:
        # 64 MiB/TC parts: leave headroom for Mosaic internal scratch / DMA descriptors.
        return 44 * _MiB, 50 * _MiB
    # 128 MiB parts (v5e / v6e): spend VMEM on weight reuse.
    return 96 * _MiB, 110 * _MiB


def _num_tensorcores(kind):
    return 2 if "v7" in kind else 1


def _vmem_block_bytes(tm, td, input_dim, itemsize, out_is_f32):
    # Auto-pipelining double-buffers each BlockSpec operand; budget everything at 2x.
    x = 2 * tm * input_dim * itemsize
    we = 2 * td * input_dim * itemsize
    wdt = 2 * td * input_dim * itemsize
    code = 2 * tm * td * itemsize
    recon = 2 * tm * input_dim * itemsize
    acc = 0 if out_is_f32 else tm * input_dim * 4
    return x + we + wdt + code + recon + acc


def _pick_tiles(batch, input_dim, dict_size, dtype, out_is_f32,
                vmem_budget, num_cores, td_floor):
    itemsize = jnp.dtype(dtype).itemsize
    sub = _sublane(dtype)

    padded_dict_min = _round_up(dict_size, 128)
    td_floor = min(td_floor, padded_dict_min)
    td_cap = min(2048, padded_dict_min)

    # Batch-tile cap: bf16 weights need tm ~1024 to reach the v6e ridge; f32 stays at 512.
    tm_cap = min(1024 if itemsize <= 2 else 512, _round_up(batch, sub))
    if num_cores >= 2 and batch > sub:
        # Guarantee >= 2 batch tiles so both v7x TensorCores get work.
        half = (batch + 1) // 2
        tm_cap = min(tm_cap, max(sub, _round_up(half, sub)))

    tm_cands = []
    tm = tm_cap
    while tm >= sub:
        tm_cands.append(tm)
        if tm == sub:
            break
        tm = max(sub, _round_up(tm // 2, sub))

    def fits(tm_, td_):
        return _vmem_block_bytes(tm_, td_, input_dim, itemsize, out_is_f32) <= vmem_budget

    # Phase 1: largest tm first (weight reuse), largest td >= floor that fits
    # (keeps the accumulator RMW off the vst slot -> MXU-bound regime).
    for tm_ in tm_cands:
        for td_ in range(td_cap, td_floor - 1, -128):
            if fits(tm_, td_):
                return tm_, td_
    # Phase 2: even the td floor does not fit at the smallest tm; relax td.
    for tm_ in tm_cands:
        for td_ in range(td_floor - 128, 127, -128):
            if fits(tm_, td_):
                return tm_, td_
    return sub, 128


# ---------------------------------------------------------------------------
# Wrapper
# ---------------------------------------------------------------------------
def sae_forward(x, enc_w, dec_w, *, tm=None, td=None):
    """Pallas SAE forward.

    Args:
      x:     [..., input_dim] activations (leading dims flattened into batch).
      enc_w: [dict_size, input_dim]  encoder weight (PyTorch nn.Linear layout).
      dec_w: [input_dim, dict_size]  decoder weight (PyTorch nn.Linear layout).
      tm, td: optional overrides for the batch / dict_size tile sizes.

    Returns:
      (reconstruction [..., input_dim], code [..., dict_size]) in enc_w.dtype.
    """
    *lead, input_dim = x.shape
    dict_size, k = enc_w.shape
    assert k == input_dim
    assert dec_w.shape == (input_dim, dict_size)

    out_dtype = enc_w.dtype
    out_is_f32 = jnp.dtype(out_dtype) == jnp.dtype(jnp.float32)

    x2 = x.reshape(-1, input_dim).astype(out_dtype)   # matches x.to(encoder.weight.dtype)
    batch = x2.shape[0]

    kind = _device_kind()
    vmem_budget, vmem_limit = _budget_and_limit(kind)
    td_floor = 256 if "v5" in kind else 512
    num_cores = _num_tensorcores(kind)

    auto_tm, auto_td = _pick_tiles(batch, input_dim, dict_size, out_dtype,
                                   out_is_f32, vmem_budget, num_cores, td_floor)
    tm = auto_tm if tm is None else tm
    td = auto_td if td is None else td
    sub = _sublane(out_dtype)
    assert tm % sub == 0, f"tm must be a multiple of {sub} for dtype {out_dtype}"
    assert td % 128 == 0, "td must be a multiple of 128 (lane constraint)"

    # One-time HBM transpose of the decoder weight -> [dict_size, input_dim]:
    # contiguous (td, input_dim) row-slab DMAs and a plain NN matmul in the kernel.
    dec_w_t = jnp.transpose(dec_w)

    # Pad dict_size up to a multiple of td with zero rows (zero rows add nothing to
    # the reconstruction; the extra zero code columns are sliced off below).
    padded_dict = _round_up(dict_size, td)
    if padded_dict != dict_size:
        pad_d = padded_dict - dict_size
        enc_w = jnp.pad(enc_w, ((0, pad_d), (0, 0)))
        dec_w_t = jnp.pad(dec_w_t, ((0, pad_d), (0, 0)))

    # Pad batch so the grid divides evenly; padded rows are sliced off below.
    padded_batch = _round_up(batch, tm)
    if padded_batch != batch:
        x2 = jnp.pad(x2, ((0, padded_batch - batch), (0, 0)))

    grid = (padded_batch // tm, padded_dict // td)

    if out_is_f32:
        kernel = _sae_kernel_f32_out
        scratch_shapes = []
    else:
        kernel = _sae_kernel_acc_scratch
        scratch_shapes = [pltpu.VMEM((tm, input_dim), jnp.float32)]

    itemsize = jnp.dtype(out_dtype).itemsize
    cost = pl.CostEstimate(
        flops=4 * padded_batch * input_dim * padded_dict,
        transcendentals=0,
        bytes_accessed=itemsize * (
            2 * padded_batch * input_dim                 # x in + recon out
            + padded_batch * padded_dict                 # code out
            + 2 * padded_dict * input_dim * grid[0]      # weights streamed per batch tile
        ),
    )

    recon, code = pl.pallas_call(
        kernel,
        out_shape=(
            jax.ShapeDtypeStruct((padded_batch, input_dim), out_dtype),
            jax.ShapeDtypeStruct((padded_batch, padded_dict), out_dtype),
        ),
        grid_spec=pltpu.PrefetchScalarGridSpec(
            num_scalar_prefetch=0,
            grid=grid,
            in_specs=[
                pl.BlockSpec((tm, input_dim), lambda i, d: (i, 0)),   # x
                pl.BlockSpec((td, input_dim), lambda i, d: (d, 0)),   # enc_w tile
                pl.BlockSpec((td, input_dim), lambda i, d: (d, 0)),   # dec_w.T tile
            ],
            out_specs=[
                pl.BlockSpec((tm, input_dim), lambda i, d: (i, 0)),   # reconstruction
                pl.BlockSpec((tm, td), lambda i, d: (i, d)),          # code
            ],
            scratch_shapes=scratch_shapes,
        ),
        compiler_params=pltpu.CompilerParams(
            dimension_semantics=("parallel", "arbitrary"),
            vmem_limit_bytes=vmem_limit,
        ),
        cost_estimate=cost,
    )(x2, enc_w, dec_w_t)

    recon = recon[:batch]
    code = code[:batch, :dict_size]
    recon = recon.reshape(*lead, input_dim) if lead else recon.reshape(input_dim)
    code = code.reshape(*lead, dict_size) if lead else code.reshape(dict_size)
    return recon, code


# ---------------------------------------------------------------------------
# Demo / correctness check (small, deterministic)
# ---------------------------------------------------------------------------
if __name__ == "__main__":
    batch, input_dim, dict_size = 20, 128, 512
    key = jax.random.PRNGKey(0)
    kx, ke, kd = jax.random.split(key, 3)

    x = jax.random.normal(kx, (batch, input_dim), dtype=jnp.float32)
    # nn.Linear default init: U(-1/sqrt(fan_in), 1/sqrt(fan_in)); deterministic here.
    enc_bound = 1.0 / jnp.sqrt(jnp.float32(input_dim))
    dec_bound = 1.0 / jnp.sqrt(jnp.float32(dict_size))
    enc_w = jax.random.uniform(ke, (dict_size, input_dim), jnp.float32,
                               -enc_bound, enc_bound)
    dec_w = jax.random.uniform(kd, (input_dim, dict_size), jnp.float32,
                               -dec_bound, dec_bound)

    # Plain-JAX reference (same semantics as the PyTorch forward).
    code_ref = x @ enc_w.T
    recon_ref = code_ref @ dec_w.T

    # 1) Automatic tile selection (f32 path accumulates into the resident output block).
    recon, code = sae_forward(x, enc_w, dec_w)
    jax.block_until_ready((recon, code))
    assert jnp.allclose(code, code_ref, atol=1e-5, rtol=1e-5)
    assert jnp.allclose(recon, recon_ref, atol=1e-5, rtol=1e-5)

    # 2) Forced small tiles: exercises batch padding + the multi-step dict_size
    #    reduction accumulated directly in the f32 output block.
    recon2, code2 = sae_forward(x, enc_w, dec_w, tm=8, td=128)
    jax.block_until_ready((recon2, code2))
    assert jnp.allclose(code2, code_ref, atol=1e-5, rtol=1e-5)
    assert jnp.allclose(recon2, recon_ref, atol=1e-5, rtol=1e-5)

    # 3) bf16 weights: exercises the f32-scratch accumulator kernel (non-f32 output),
    #    matching PyTorch's "cast x to weight dtype" semantics.
    enc_bf = enc_w.astype(jnp.bfloat16)
    dec_bf = dec_w.astype(jnp.bfloat16)
    code_bref = jnp.dot(x.astype(jnp.bfloat16), enc_bf.T,
                        preferred_element_type=jnp.float32)
    recon_bref = jnp.dot(code_bref.astype(jnp.bfloat16), dec_bf.T,
                         preferred_element_type=jnp.float32)
    recon_b, code_b = sae_forward(x, enc_bf, dec_bf, tm=16, td=128)
    jax.block_until_ready((recon_b, code_b))
    assert jnp.allclose(code_b.astype(jnp.float32), code_bref, atol=5e-2, rtol=5e-2)
    assert jnp.allclose(recon_b.astype(jnp.float32), recon_bref, atol=5e-2, rtol=5e-2)

    print("KERNEL_OK")
</pallas_src>

<mosaic_0001>
module attributes {stable_mosaic.version = 11 : i64} {
  func.func @_sae_kernel_f32_out(%arg0: i32, %arg1: i32, %arg2: memref<24x128xf32, #tpu.memory_space<vmem>>, %arg3: memref<512x128xf32, #tpu.memory_space<vmem>>, %arg4: memref<512x128xf32, #tpu.memory_space<vmem>>, %arg5: memref<24x128xf32, #tpu.memory_space<vmem>>, %arg6: memref<24x512xf32, #tpu.memory_space<vmem>>) attributes {dimension_semantics = [#tpu.dimension_semantics<parallel>, #tpu.dimension_semantics<arbitrary>], iteration_bounds = array<i64: 1, 1>, scalar_prefetch = 0 : i64, scratch_operands = 0 : i64, tpu.core_type = #tpu.core_type<tc>, window_params = [{transform_indices = @transform_0, window_bounds = array<i64: 24, 128>}, {transform_indices = @transform_1, window_bounds = array<i64: 512, 128>}, {transform_indices = @transform_2, window_bounds = array<i64: 512, 128>}, {transform_indices = @transform_3, window_bounds = array<i64: 24, 128>}, {transform_indices = @transform_4, window_bounds = array<i64: 24, 512>}]} {
    %c0_i32 = arith.constant 0 : i32
    %0 = arith.cmpi eq, %arg1, %c0_i32 : i32
    %1 = arith.extui %0 : i1 to i32
    %c0_i32_0 = arith.constant 0 : i32
    %2 = arith.cmpi ne, %1, %c0_i32_0 : i32
    scf.if %2 {
      %cst_13 = arith.constant 0.000000e+00 : f32
      %12 = vector.broadcast %cst_13 : f32 to vector<24x128xf32>
      %c0_14 = arith.constant 0 : index
      %c0_15 = arith.constant 0 : index
      %13 = vector.load %arg5[%c0_14, %c0_15] : memref<24x128xf32, #tpu.memory_space<vmem>>, vector<24x128xf32>
      tpu.vector_store %arg5[%c0_14, %c0_15], %12 {strides = array<i32>} : memref<24x128xf32, #tpu.memory_space<vmem>>, vector<24x128xf32>,
    } else {
    }
    %c0 = arith.constant 0 : index
    %c0_1 = arith.constant 0 : index
    %3 = vector.load %arg2[%c0, %c0_1] : memref<24x128xf32, #tpu.memory_space<vmem>>, vector<24x128xf32>
    %c0_2 = arith.constant 0 : index
    %c0_3 = arith.constant 0 : index
    %4 = vector.load %arg3[%c0_2, %c0_3] : memref<512x128xf32, #tpu.memory_space<vmem>>, vector<512x128xf32>
    %cst = arith.constant dense<0.000000e+00> : vector<24x512xf32>
    %5 = tpu.matmul %3, %4, %cst {dimension_numbers = #tpu.dot_dimension_numbers<[1], [1], [0], [0], [0, 0, 1, 0], [], []>} : vector<24x128xf32>, vector<512x128xf32>, vector<24x512xf32> -> vector<24x512xf32>
    %c0_4 = arith.constant 0 : index
    %c0_5 = arith.constant 0 : index
    %6 = vector.load %arg6[%c0_4, %c0_5] : memref<24x512xf32, #tpu.memory_space<vmem>>, vector<24x512xf32>
    tpu.vector_store %arg6[%c0_4, %c0_5], %5 {strides = array<i32>} : memref<24x512xf32, #tpu.memory_space<vmem>>, vector<24x512xf32>,
    %c0_6 = arith.constant 0 : index
    %c0_7 = arith.constant 0 : index
    %7 = vector.load %arg5[%c0_6, %c0_7] : memref<24x128xf32, #tpu.memory_space<vmem>>, vector<24x128xf32>
    %c0_8 = arith.constant 0 : index
    %c0_9 = arith.constant 0 : index
    %8 = vector.load %arg4[%c0_8, %c0_9] : memref<512x128xf32, #tpu.memory_space<vmem>>, vector<512x128xf32>
    %cst_10 = arith.constant dense<0.000000e+00> : vector<24x128xf32>
    %9 = tpu.matmul %5, %8, %cst_10 {dimension_numbers = #tpu.dot_dimension_numbers<[1], [0], [0], [1], [0, 0, 1, 1], [], []>} : vector<24x512xf32>, vector<512x128xf32>, vector<24x128xf32> -> vector<24x128xf32>
    %10 = arith.addf %7, %9 : vector<24x128xf32>
    %c0_11 = arith.constant 0 : index
    %c0_12 = arith.constant 0 : index
    %11 = vector.load %arg5[%c0_11, %c0_12] : memref<24x128xf32, #tpu.memory_space<vmem>>, vector<24x128xf32>
    tpu.vector_store %arg5[%c0_11, %c0_12], %10 {strides = array<i32>} : memref<24x128xf32, #tpu.memory_space<vmem>>, vector<24x128xf32>,
    return
  }
  func.func @transform_0(%arg0: i32, %arg1: i32) -> (i32, i32) {
    %c0_i32 = arith.constant 0 : i32
    %c0_i32_0 = arith.constant 0 : i32
    return %arg0, %c0_i32 : i32, i32
  }
  func.func @transform_1(%arg0: i32, %arg1: i32) -> (i32, i32) {
    %c0_i32 = arith.constant 0 : i32
    %c0_i32_0 = arith.constant 0 : i32
    return %arg1, %c0_i32 : i32, i32
  }
  func.func @transform_2(%arg0: i32, %arg1: i32) -> (i32, i32) {
    %c0_i32 = arith.constant 0 : i32
    %c0_i32_0 = arith.constant 0 : i32
    return %arg1, %c0_i32 : i32, i32
  }
  func.func @transform_3(%arg0: i32, %arg1: i32) -> (i32, i32) {
    %c0_i32 = arith.constant 0 : i32
    %c0_i32_0 = arith.constant 0 : i32
    return %arg0, %c0_i32 : i32, i32
  }
  func.func @transform_4(%arg0: i32, %arg1: i32) -> (i32, i32) {
    %c0_i32 = arith.constant 0 : i32
    return %arg0, %arg1 : i32, i32
  }
}

</mosaic_0001>

<bundles_post_ra>
// kernel: tpu_custom_call.1
= control target key start
LH: loop header
LB: loop body
LE: loop exit
PB: predicated region body
PF: predicated region fallthrough
CT: control target
= control target key end

     0   :  { %10 = vsyncpa [#allocation3], 0  ;;  %s1111_s0 = inlined_call_operand.hbm [shape: f32[24,128], index: 0, kind: input, shape index: {}]   ;;  %s1112_s1 = inlined_call_operand.hbm [shape: f32[512,128], index: 1, kind: input, shape index: {}]   ;;  %s1113_s2 = inlined_call_operand.hbm [shape: f32[512,128], index: 2, kind: input, shape index: {}]   ;;  %s1114_s3 = inlined_call_operand.hbm [shape: f32[24,128], index: 3, kind: output, shape index: {0}]   ;;  %s1115_s4 = inlined_call_operand.hbm [shape: f32[24,512], index: 4, kind: output, shape index: {1}]  }
   0x1   :  { %11 = vsyncpa [#allocation6], 0 }
   0x2   :  { %12 = vsyncpa [#allocation4], 0 }
   0x3   :  { %13 = vsyncpa [#allocation10], 0  ;;  %s992_s15 = smov [#allocation5]   ;;  %s993_s17 = smov [#allocation2]  }
   0x4   :  { %s31_s16 = sshll.u32 %s992_s15, 4  ;;  %s19_s18 = sshll.u32 %s993_s17, 4  ;;  %s32_s16 = int_to_ptr.vmem [resolvable:$true] %s31_s16  ;;  %s1026_s18 = int_to_ptr.vmem [resolvable:$true] %s19_s18 }
   0x5   :  { %s874_s21 = scalar_lea.hbm %s1112_s1, 8192 }
   0x6   :  { %p875_p0 = scmp.ne.s32.totalorder %s1112_s1, %s874_s21  ;;  %p878_p1 = scmp.lt.u32.totalorder %s874_s21, %s1112_s1 }
   0x8   :  { %p880_p2 = pnand %p878_p1, %p875_p0 }
   0xa   :  { %883 = shalt.err (!%p880_p2)
}
   0xb   :  { %s884_s26 = scalar_lea.vmem %s32_s16, 8192  ;;  %p889_p4 = scmp.lt.s32.totalorder %s32_s16, %s32_s16 }
   0xc   :  { %p885_p3 = scmp.ne.s32.totalorder %s32_s16, %s884_s26  ;;  %p890_p5 = scmp.lt.s32.totalorder %s884_s26, %s884_s26 }
   0xe   :  { %p891_p6 = por %p890_p5, %p889_p4 }
  0x10   :  { %p892_p7 = pnand %p891_p6, %p885_p3 }
  0x12   :  { %895 = shalt.err (!%p892_p7)
}
  0x13   :  { %s994_s27 = smov 128   ;;  %s995_s28 = smov 8  }
  0x14   :  { %37 = dma.hbm_to_vmem [thread:$0]  %s1112_s1, 8192, %s32_s16, [#allocation6], %s994_s27, %s994_s27, %s995_s28  }
  0x15   :  { %s896_s7 = scalar_lea.hbm %s1111_s0, 384 }
  0x16   :  { %p897_p8 = scmp.ne.s32.totalorder %s1111_s0, %s896_s7  ;;  %p900_p9 = scmp.lt.u32.totalorder %s896_s7, %s1111_s0 }
  0x18   :  { %p902_p10 = pnand %p900_p9, %p897_p8 }
  0x1a   :  { %905 = shalt.err (!%p902_p10)
}
  0x1b   :  { %s906_s12 = scalar_lea.vmem %s1026_s18, 384  ;;  %p911_p12 = scmp.lt.s32.totalorder %s1026_s18, %s1026_s18 }
  0x1c   :  { %p907_p11 = scmp.ne.s32.totalorder %s1026_s18, %s906_s12  ;;  %p912_p13 = scmp.lt.s32.totalorder %s906_s12, %s906_s12 }
  0x1e   :  { %p913_p0 = por %p912_p13, %p911_p12 }
  0x20   :  { %p914_p1 = pnand %p913_p0, %p907_p11 }
  0x22   :  { %917 = shalt.err (!%p914_p1)
}
  0x23   :  { %25 = dma.hbm_to_vmem [thread:$0]  %s1111_s0, 384, %s1026_s18, [#allocation3], %s994_s27, %s994_s27, %s995_s28  }
  0x24   :  { %s996_s14 = smov [#allocation7]   ;;  %s918_s19 = scalar_lea.hbm %s1113_s2, 8192 }
  0x25   :  { %s43_s15 = sshll.u32 %s996_s14, 4  ;;  %p919_p2 = scmp.ne.s32.totalorder %s1113_s2, %s918_s19  ;;  %s44_s15 = int_to_ptr.vmem [resolvable:$true] %s43_s15 }
  0x26   :  { %p922_p3 = scmp.lt.u32.totalorder %s918_s19, %s1113_s2 }
  0x28   :  { %p924_p4 = pnand %p922_p3, %p919_p2 }
  0x2a   :  { %927 = shalt.err (!%p924_p4)
}
  0x2b   :  { %s928_s24 = scalar_lea.vmem %s44_s15, 8192  ;;  %p933_p6 = scmp.lt.s32.totalorder %s44_s15, %s44_s15 }
  0x2c   :  { %p929_p5 = scmp.ne.s32.totalorder %s44_s15, %s928_s24  ;;  %p934_p7 = scmp.lt.s32.totalorder %s928_s24, %s928_s24 }
  0x2e   :  { %p935_p8 = por %p934_p7, %p933_p6 }
  0x30   :  { %p936_p9 = pnand %p935_p8, %p929_p5 }
  0x32   :  { %939 = shalt.err (!%p936_p9)
}
  0x33   :  { %49 = dma.hbm_to_vmem [thread:$0]  %s1113_s2, 8192, %s44_s15, [#allocation6], %s994_s27, %s994_s27, %s995_s28  }
  0x34   :  { %984 = dma.done.wait [#allocation3], 384  }
  0x35   :  { %985 = vsyncadd [#allocation3], 4294966912 }
  0x36   :  { %986 = dma.done.wait [#allocation6], 16384  }
  0x37   :  { %987 = vsyncadd [#allocation6], 4294950912  ;;  %v85_v0 = vld [vmem:[#allocation5 + $0x80] sm:$0xff]  ;;  %v86_v1 = vld [vmem:[#allocation5 + $0x88] sm:$0xff]  ;;  %s997_s2 = smov [#allocation9]  }
  0x38   :  { %v117_v2 = vld [vmem:[#allocation5 + $0x180] sm:$0xff]  ;;  %v736_v3 = vpack.c.bf16 %v86_v1, %v85_v0  ;;  %v118_v4 = vld [vmem:[#allocation5 + $0x188] sm:$0xff]  ;;  %v87_v11 = vld [vmem:[#allocation5 + $0x90] sm:$0xff]  ;;  %s561_s25 = sshll.u32 %s997_s2, 4  ;;  %s562_s25 = int_to_ptr.vmem [resolvable:$true] %s561_s25 }
  0x39   :  { %v69_v5 = vld [vmem:[#allocation5] sm:$0xff]  ;;  %v70_v6 = vld [vmem:[#allocation5 + $0x8] sm:$0xff]  ;;  %v768_v7 = vpack.c.bf16 %v118_v4, %v117_v2  ;;  %v88_v13 = vld [vmem:[#allocation5 + $0x98] sm:$0xff]  ;;  %s940_s26 = scalar_lea.vmem %s562_s25, 1536  ;;  %p945_p11 = scmp.lt.s32.totalorder %s562_s25, %s562_s25 }
  0x3a   :  { %v738_v8 = vpack.c.bf16 %v70_v6, %v69_v5  ;;  %v101_v9 = vld [vmem:[#allocation5 + $0x100] sm:$0xff]  ;;  %v102_v10 = vld [vmem:[#allocation5 + $0x108] sm:$0xff]  ;;  %737 = vmatprep.subr.bf16.mxu0 %v736_v3  ;;  %v119_v14 = vld [vmem:[#allocation5 + $0x190] sm:$0xff]  ;;  %v740_v16 = vpack.c.bf16 %v88_v13, %v87_v11  ;;  %p941_p10 = scmp.ne.s32.totalorder %s562_s25, %s940_s26  ;;  %p946_p12 = scmp.lt.s32.totalorder %s940_s26, %s940_s26 }
  0x3b   :  { %v770_v12 = vpack.c.bf16 %v102_v10, %v101_v9  ;;  %v120_v15 = vld [vmem:[#allocation5 + $0x198] sm:$0xff]  ;;  %769 = vmatprep.subr.bf16.mxu1 %v768_v7  ;;  %v71_v18 = vld [vmem:[#allocation5 + $0x10] sm:$0xff]  ;;  %v89_v22 = vld [vmem:[#allocation5 + $0xa0] sm:$0xff] }
  0x3c   :  { %739 = vmatpush3.bf16.xpose.msra.mxu0 %v738_v8  ;;  %v772_v17 = vpack.c.bf16 %v120_v15, %v119_v14  ;;  %v72_v19 = vld [vmem:[#allocation5 + $0x18] sm:$0xff]  ;;  %v103_v20 = vld [vmem:[#allocation5 + $0x110] sm:$0xff]  ;;  %v90_v23 = vld [vmem:[#allocation5 + $0xa8] sm:$0xff]  ;;  %p947_p13 = por %p946_p12, %p945_p11 }
  0x3d   :  { %771 = vmatpush3.bf16.xpose.msra.mxu1 %v770_v12  ;;  %741 = vmatprep.subr.bf16.mxu0 %v740_v16  ;;  %v104_v21 = vld [vmem:[#allocation5 + $0x118] sm:$0xff]  ;;  %v121_v24 = vld [vmem:[#allocation5 + $0x1a0] sm:$0xff]  ;;  %v122_v25 = vld [vmem:[#allocation5 + $0x1a8] sm:$0xff]  ;;  %v742_v26 = vpack.c.bf16 %v72_v19, %v71_v18  ;;  %v744_v28 = vpack.c.bf16 %v90_v23, %v89_v22 }
  0x3e   :  { %773 = vmatprep.subr.bf16.mxu1 %v772_v17  ;;  %v774_v27 = vpack.c.bf16 %v104_v21, %v103_v20  ;;  %v776_v29 = vpack.c.bf16 %v122_v25, %v121_v24  ;;  %v73_v30 = vld [vmem:[#allocation5 + $0x20] sm:$0xff]  ;;  %v74_v31 = vld [vmem:[#allocation5 + $0x28] sm:$0xff]  ;;  %v91_v34 = vld [vmem:[#allocation5 + $0xb0] sm:$0xff]  ;;  %p948_p0 = pnand %p947_p13, %p941_p10 }
  0x3f   :  { %v105_v32 = vld [vmem:[#allocation5 + $0x120] sm:$0xff]  ;;  %v106_v33 = vld [vmem:[#allocation5 + $0x128] sm:$0xff]  ;;  %v92_v35 = vld [vmem:[#allocation5 + $0xb8] sm:$0xff]  ;;  %v746_v38 = vpack.c.bf16 %v74_v31, %v73_v30 }
  0x40   :  { %v123_v36 = vld [vmem:[#allocation5 + $0x1b0] sm:$0xff]  ;;  %v124_v37 = vld [vmem:[#allocation5 + $0x1b8] sm:$0xff]  ;;  %v778_v39 = vpack.c.bf16 %v106_v33, %v105_v32  ;;  %v748_v40 = vpack.c.bf16 %v92_v35, %v91_v34  ;;  %v1078_v45 = vld [vmem:[#allocation2] sm:$0xff] }
  0x41   :  { %v780_v41 = vpack.c.bf16 %v124_v37, %v123_v36  ;;  %v75_v42 = vld [vmem:[#allocation5 + $0x30] sm:$0xff]  ;;  %v76_v43 = vld [vmem:[#allocation5 + $0x38] sm:$0xff]  ;;  %v93_v47 = vld [vmem:[#allocation5 + $0xc0] sm:$0xff]  ;;  %610 = vmatprep.mubr.f32.mxu0 %v1078_v45  ;;  %648 = vmatprep.mubr.f32.mxu1 %v1078_v45 }
  0x42   :  { %v107_v44 = vld [vmem:[#allocation5 + $0x130] sm:$0xff]  ;;  %v108_v46 = vld [vmem:[#allocation5 + $0x138] sm:$0xff]  ;;  %v94_v48 = vld [vmem:[#allocation5 + $0xc8] sm:$0xff]  ;;  %v750_v51 = vpack.c.bf16 %v76_v43, %v75_v42 }
  0x43   :  { %v125_v49 = vld [vmem:[#allocation5 + $0x1c0] sm:$0xff]  ;;  %v126_v50 = vld [vmem:[#allocation5 + $0x1c8] sm:$0xff]  ;;  %v782_v52 = vpack.c.bf16 %v108_v46, %v107_v44  ;;  %v752_v53 = vpack.c.bf16 %v94_v48, %v93_v47  ;;  %v95_v59 = vld [vmem:[#allocation5 + $0xd0] sm:$0xff] }
  0x44   :  { %743 = vmatpush3.bf16.xpose.msra.mxu0 %v742_v26  ;;  %v784_v54 = vpack.c.bf16 %v126_v50, %v125_v49  ;;  %v77_v55 = vld [vmem:[#allocation5 + $0x40] sm:$0xff]  ;;  %v78_v56 = vld [vmem:[#allocation5 + $0x48] sm:$0xff]  ;;  %v96_v60 = vld [vmem:[#allocation5 + $0xd8] sm:$0xff] }
  0x45   :  { %775 = vmatpush3.bf16.xpose.msra.mxu1 %v774_v27  ;;  %745 = vmatprep.subr.bf16.mxu0 %v744_v28  ;;  %v109_v57 = vld [vmem:[#allocation5 + $0x140] sm:$0xff]  ;;  %v110_v58 = vld [vmem:[#allocation5 + $0x148] sm:$0xff]  ;;  %v127_v61 = vld [vmem:[#allocation5 + $0x1d0] sm:$0xff]  ;;  %v754_v63 = vpack.c.bf16 %v78_v56, %v77_v55  ;;  %v756_v1 = vpack.c.bf16 %v96_v60, %v95_v59 }
  0x46   :  { %777 = vmatprep.subr.bf16.mxu1 %v776_v29  ;;  %v128_v62 = vld [vmem:[#allocation5 + $0x1d8] sm:$0xff]  ;;  %v786_v0 = vpack.c.bf16 %v110_v58, %v109_v57  ;;  %v79_v3 = vld [vmem:[#allocation5 + $0x50] sm:$0xff]  ;;  %v97_v7 = vld [vmem:[#allocation5 + $0xe0] sm:$0xff] }
  0x47   :  { %v788_v2 = vpack.c.bf16 %v128_v62, %v127_v61  ;;  %v80_v4 = vld [vmem:[#allocation5 + $0x58] sm:$0xff]  ;;  %v111_v5 = vld [vmem:[#allocation5 + $0x150] sm:$0xff]  ;;  %v98_v8 = vld [vmem:[#allocation5 + $0xe8] sm:$0xff] }
  0x48   :  { %v112_v6 = vld [vmem:[#allocation5 + $0x158] sm:$0xff]  ;;  %v129_v9 = vld [vmem:[#allocation5 + $0x1e0] sm:$0xff]  ;;  %v130_v10 = vld [vmem:[#allocation5 + $0x1e8] sm:$0xff]  ;;  %v758_v11 = vpack.c.bf16 %v80_v4, %v79_v3  ;;  %v760_v13 = vpack.c.bf16 %v98_v8, %v97_v7 }
  0x49   :  { %v790_v12 = vpack.c.bf16 %v112_v6, %v111_v5  ;;  %v792_v14 = vpack.c.bf16 %v130_v10, %v129_v9  ;;  %v81_v15 = vld [vmem:[#allocation5 + $0x60] sm:$0xff]  ;;  %v82_v16 = vld [vmem:[#allocation5 + $0x68] sm:$0xff]  ;;  %v99_v19 = vld [vmem:[#allocation5 + $0xf0] sm:$0xff] }
  0x4a   :  { %v113_v17 = vld [vmem:[#allocation5 + $0x160] sm:$0xff]  ;;  %v114_v18 = vld [vmem:[#allocation5 + $0x168] sm:$0xff]  ;;  %v100_v20 = vld [vmem:[#allocation5 + $0xf8] sm:$0xff]  ;;  %v762_v23 = vpack.c.bf16 %v82_v16, %v81_v15 }
  0x4b   :  { %v131_v21 = vld [vmem:[#allocation5 + $0x1f0] sm:$0xff]  ;;  %v132_v22 = vld [vmem:[#allocation5 + $0x1f8] sm:$0xff]  ;;  %v794_v24 = vpack.c.bf16 %v114_v18, %v113_v17  ;;  %v764_v25 = vpack.c.bf16 %v100_v20, %v99_v19  ;;  %v330_v31 = vld [vmem:[#allocation7 + $0x80] sm:$0xff] }
  0x4c   :  { %747 = vmatpush3.bf16.xpose.msra.mxu0 %v746_v38  ;;  %v796_v26 = vpack.c.bf16 %v132_v22, %v131_v21  ;;  %v83_v27 = vld [vmem:[#allocation5 + $0x70] sm:$0xff]  ;;  %v84_v28 = vld [vmem:[#allocation5 + $0x78] sm:$0xff]  ;;  %v331_v32 = vld [vmem:[#allocation7 + $0x88] sm:$0xff] }
  0x4d   :  { %779 = vmatpush3.bf16.xpose.msra.mxu1 %v778_v39  ;;  %749 = vmatprep.subr.bf16.mxu0 %v748_v40  ;;  %v115_v29 = vld [vmem:[#allocation5 + $0x170] sm:$0xff]  ;;  %v116_v30 = vld [vmem:[#allocation5 + $0x178] sm:$0xff]  ;;  %v362_v33 = vld [vmem:[#allocation7 + $0x180] sm:$0xff]  ;;  %v766_v35 = vpack.c.bf16 %v84_v28, %v83_v27  ;;  %v800_v37 = vpack.c.bf16 %v331_v32, %v330_v31 }
  0x4e   :  { %781 = vmatprep.subr.bf16.mxu1 %v780_v41  ;;  %v363_v34 = vld [vmem:[#allocation7 + $0x188] sm:$0xff]  ;;  %v798_v36 = vpack.c.bf16 %v116_v30, %v115_v29  ;;  %v314_v39 = vld [vmem:[#allocation7] sm:$0xff]  ;;  %v332_v43 = vld [vmem:[#allocation7 + $0x90] sm:$0xff] }
  0x4f   :  { %v832_v38 = vpack.c.bf16 %v363_v34, %v362_v33  ;;  %v315_v40 = vld [vmem:[#allocation7 + $0x8] sm:$0xff]  ;;  %v346_v41 = vld [vmem:[#allocation7 + $0x100] sm:$0xff]  ;;  %v333_v44 = vld [vmem:[#allocation7 + $0x98] sm:$0xff] }
  0x50   :  { %v347_v42 = vld [vmem:[#allocation7 + $0x108] sm:$0xff]  ;;  %v364_v46 = vld [vmem:[#allocation7 + $0x190] sm:$0xff]  ;;  %v365_v47 = vld [vmem:[#allocation7 + $0x198] sm:$0xff]  ;;  %v802_v49 = vpack.c.bf16 %v315_v40, %v314_v39 }
  0x51   :  { %v67_v48 = vld [vmem:[#allocation2 + $0x8] sm:$0xff]  ;;  %v834_v50 = vpack.c.bf16 %v347_v42, %v346_v41  ;;  %v836_v55 = vpack.c.bf16 %v365_v47, %v364_v46  ;;  %v349_v56 = vld [vmem:[#allocation7 + $0x118] sm:$0xff]  ;;  %v334_v57 = vld [vmem:[#allocation7 + $0xa0] sm:$0xff] }
  0x52   :  { %v335_v58 = vld [vmem:[#allocation7 + $0xa8] sm:$0xff]  ;;  %v366_v59 = vld [vmem:[#allocation7 + $0x1a0] sm:$0xff]  ;;  %v68_v61 = vld [vmem:[#allocation2 + $0x10] sm:$0xff] }
  0x53   :  { %v367_v60 = vld [vmem:[#allocation7 + $0x1a8] sm:$0xff]  ;;  %v350_v3 = vld [vmem:[#allocation7 + $0x120] sm:$0xff]  ;;  %v336_v6 = vld [vmem:[#allocation7 + $0xb0] sm:$0xff] }
  0x54   :  { %751 = vmatpush3.bf16.xpose.msra.mxu0 %v750_v51  ;;  %v804_v51 = vpack.c.bf16 %v333_v44, %v332_v43  ;;  %v840_v4 = vpack.c.bf16 %v367_v60, %v366_v59  ;;  %v351_v5 = vld [vmem:[#allocation7 + $0x128] sm:$0xff]  ;;  %v368_v7 = vld [vmem:[#allocation7 + $0x1b0] sm:$0xff]  ;;  %v369_v8 = vld [vmem:[#allocation7 + $0x1b8] sm:$0xff] }
  0x55   :  { %783 = vmatpush3.bf16.xpose.msra.mxu1 %v782_v52  ;;  %753 = vmatprep.subr.bf16.mxu0 %v752_v53  ;;  %v316_v52 = vld [vmem:[#allocation7 + $0x10] sm:$0xff]  ;;  %v317_v53 = vld [vmem:[#allocation7 + $0x18] sm:$0xff]  ;;  %v842_v10 = vpack.c.bf16 %v351_v5, %v350_v3  ;;  %v844_v15 = vpack.c.bf16 %v369_v8, %v368_v7  ;;  %v338_v17 = vld [vmem:[#allocation7 + $0xc0] sm:$0xff] }
  0x56   :  { %785 = vmatprep.subr.bf16.mxu1 %v784_v54  ;;  %v348_v54 = vld [vmem:[#allocation7 + $0x110] sm:$0xff]  ;;  %v806_v62 = vpack.c.bf16 %v317_v53, %v316_v52  ;;  %v353_v16 = vld [vmem:[#allocation7 + $0x138] sm:$0xff]  ;;  %v339_v18 = vld [vmem:[#allocation7 + $0xc8] sm:$0xff] }
  0x57   :  { %v370_v19 = vld [vmem:[#allocation7 + $0x1c0] sm:$0xff]  ;;  %v371_v20 = vld [vmem:[#allocation7 + $0x1c8] sm:$0xff]  ;;  %v340_v29 = vld [vmem:[#allocation7 + $0xd0] sm:$0xff] }
  0x58   :  { %v848_v27 = vpack.c.bf16 %v371_v20, %v370_v19  ;;  %v355_v28 = vld [vmem:[#allocation7 + $0x148] sm:$0xff]  ;;  %v341_v30 = vld [vmem:[#allocation7 + $0xd8] sm:$0xff]  ;;  %v372_v31 = vld [vmem:[#allocation7 + $0x1d0] sm:$0xff] }
  0x59   :  { %v373_v32 = vld [vmem:[#allocation7 + $0x1d8] sm:$0xff]  ;;  %v342_v41 = vld [vmem:[#allocation7 + $0xe0] sm:$0xff]  ;;  %v343_v42 = vld [vmem:[#allocation7 + $0xe8] sm:$0xff] }
  0x5a   :  { %v852_v39 = vpack.c.bf16 %v373_v32, %v372_v31  ;;  %v357_v40 = vld [vmem:[#allocation7 + $0x158] sm:$0xff]  ;;  %v374_v43 = vld [vmem:[#allocation7 + $0x1e0] sm:$0xff]  ;;  %v375_v44 = vld [vmem:[#allocation7 + $0x1e8] sm:$0xff] }
  0x5b   :  { %v856_v52 = vpack.c.bf16 %v375_v44, %v374_v43  ;;  %v359_v53 = vld [vmem:[#allocation7 + $0x168] sm:$0xff] }
  0x5c   :  { %755 = vmatpush3.bf16.xpose.msra.mxu0 %v754_v63  ;;  %v838_v63 = vpack.c.bf16 %v349_v56, %v348_v54  ;;  %v344_v54 = vld [vmem:[#allocation7 + $0xf0] sm:$0xff] }
  0x5d   :  { %787 = vmatpush3.bf16.xpose.msra.mxu1 %v786_v0  ;;  %757 = vmatprep.subr.bf16.mxu0 %v756_v1  ;;  %v808_v0 = vpack.c.bf16 %v335_v58, %v334_v57  ;;  %v318_v1 = vld [vmem:[#allocation7 + $0x20] sm:$0xff]  ;;  %v376_v56 = vld [vmem:[#allocation7 + $0x1f0] sm:$0xff]  ;;  %v377_v57 = vld [vmem:[#allocation7 + $0x1f8] sm:$0xff] }
  0x5e   :  { %789 = vmatprep.subr.bf16.mxu1 %v788_v2  ;;  %v319_v2 = vld [vmem:[#allocation7 + $0x28] sm:$0xff] }
  0x5f   :  { %v810_v9 = vpack.c.bf16 %v319_v2, %v318_v1  ;;  %v361_v2 = vld [vmem:[#allocation7 + $0x178] sm:$0xff] }
  0x64   :  { %759 = vmatpush3.bf16.xpose.msra.mxu0 %v758_v11 }
  0x65   :  { %791 = vmatpush3.bf16.xpose.msra.mxu1 %v790_v12  ;;  %761 = vmatprep.subr.bf16.mxu0 %v760_v13  ;;  %v320_v12 = vld [vmem:[#allocation7 + $0x30] sm:$0xff]  ;;  %v321_v13 = vld [vmem:[#allocation7 + $0x38] sm:$0xff] }
  0x66   :  { %793 = vmatprep.subr.bf16.mxu1 %v792_v14  ;;  %v352_v14 = vld [vmem:[#allocation7 + $0x130] sm:$0xff]  ;;  %v814_v21 = vpack.c.bf16 %v321_v13, %v320_v12 }
  0x67   :  { %v846_v22 = vpack.c.bf16 %v353_v16, %v352_v14 }
  0x6c   :  { %763 = vmatpush3.bf16.xpose.msra.mxu0 %v762_v23  ;;  %v816_v23 = vpack.c.bf16 %v339_v18, %v338_v17 }
  0x6d   :  { %795 = vmatpush3.bf16.xpose.msra.mxu1 %v794_v24  ;;  %765 = vmatprep.subr.bf16.mxu0 %v764_v25  ;;  %v322_v24 = vld [vmem:[#allocation7 + $0x40] sm:$0xff]  ;;  %v323_v25 = vld [vmem:[#allocation7 + $0x48] sm:$0xff] }
  0x6e   :  { %797 = vmatprep.subr.bf16.mxu1 %v796_v26  ;;  %v354_v26 = vld [vmem:[#allocation7 + $0x140] sm:$0xff]  ;;  %v818_v33 = vpack.c.bf16 %v323_v25, %v322_v24 }
  0x6f   :  { %v850_v34 = vpack.c.bf16 %v355_v28, %v354_v26 }
  0x74   :  { %767 = vmatpush3.bf16.xpose.msra.mxu0 %v766_v35  ;;  %v820_v35 = vpack.c.bf16 %v341_v30, %v340_v29 }
  0x75   :  { %799 = vmatpush3.bf16.xpose.msra.mxu1 %v798_v36  ;;  %801 = vmatprep.subr.bf16.mxu0 %v800_v37  ;;  %v324_v36 = vld [vmem:[#allocation7 + $0x50] sm:$0xff]  ;;  %v325_v37 = vld [vmem:[#allocation7 + $0x58] sm:$0xff] }
  0x76   :  { %833 = vmatprep.subr.bf16.mxu1 %v832_v38  ;;  %v356_v38 = vld [vmem:[#allocation7 + $0x150] sm:$0xff]  ;;  %v822_v46 = vpack.c.bf16 %v325_v37, %v324_v36 }
  0x77   :  { %v854_v47 = vpack.c.bf16 %v357_v40, %v356_v38 }
  0x7b   :  { %611 = vmatmul.mubr.f32.vlgmr.msra.gmra.mrb[0].mxu0 %v1078_v45 }
  0x7c   :  { %649 = vmatmul.mubr.f32.vlgmr.msra.gmra.mrb[0].mxu1 %v1078_v45  ;;  %612 = vmatprep.mubr.f32.mxu0 %v67_v48  ;;  %v337_v45 = vld [vmem:[#allocation7 + $0xb8] sm:$0xff] }
  0x7d   :  { %650 = vmatprep.mubr.f32.mxu1 %v67_v48  ;;  %803 = vmatpush3.bf16.msra.mxu0 %v802_v49  ;;  %v812_v11 = vpack.c.bf16 %v337_v45, %v336_v6  ;;  %v326_v49 = vld [vmem:[#allocation7 + $0x60] sm:$0xff] }
  0x7e   :  { %835 = vmatpush3.bf16.msra.mxu1 %v834_v50  ;;  %805 = vmatprep.subr.bf16.mxu0 %v804_v51  ;;  %v327_v50 = vld [vmem:[#allocation7 + $0x68] sm:$0xff]  ;;  %v358_v51 = vld [vmem:[#allocation7 + $0x160] sm:$0xff] }
  0x7f   :  { %613 = vmatmul.mubr.f32.gmra.mrb[2].mxu0 %v67_v48  ;;  %837 = vmatprep.subr.bf16.mxu1 %v836_v55  ;;  %v345_v55 = vld [vmem:[#allocation7 + $0xf8] sm:$0xff]  ;;  %v826_v58 = vpack.c.bf16 %v327_v50, %v326_v49  ;;  %v858_v59 = vpack.c.bf16 %v359_v53, %v358_v51 }
  0x80   :  { %651 = vmatmul.mubr.f32.gmra.mrb[2].mxu1 %v67_v48  ;;  %614 = vmatprep.mubr.f32.mxu0 %v68_v61  ;;  %v824_v48 = vpack.c.bf16 %v343_v42, %v342_v41  ;;  %v828_v60 = vpack.c.bf16 %v345_v55, %v344_v54 }
  0x81   :  { %652 = vmatprep.mubr.f32.mxu1 %v68_v61  ;;  %807 = vmatpush3.bf16.msra.mxu0 %v806_v62  ;;  %v328_v62 = vld [vmem:[#allocation7 + $0x70] sm:$0xff] }
  0x82   :  { %839 = vmatpush3.bf16.msra.mxu1 %v838_v63  ;;  %809 = vmatprep.subr.bf16.mxu0 %v808_v0  ;;  %v329_v63 = vld [vmem:[#allocation7 + $0x78] sm:$0xff]  ;;  %v360_v0 = vld [vmem:[#allocation7 + $0x170] sm:$0xff] }
  0x83   :  { %615 = vmatmul.mubr.f32.gmra.mrb[4].mxu0 %v68_v61  ;;  %841 = vmatprep.subr.bf16.mxu1 %v840_v4  ;;  %v830_v1 = vpack.c.bf16 %v329_v63, %v328_v62  ;;  %v862_v3 = vpack.c.bf16 %v361_v2, %v360_v0 }
  0x84   :  { %653 = vmatmul.mubr.f32.gmra.mrb[4].mxu1 %v68_v61  ;;  %v860_v61 = vpack.c.bf16 %v377_v57, %v376_v56 }
  0x85   :  { %811 = vmatpush3.bf16.msra.mxu0 %v810_v9 }
  0x86   :  { %843 = vmatpush3.bf16.msra.mxu1 %v842_v10  ;;  %813 = vmatprep.subr.bf16.mxu0 %v812_v11 }
  0x87   :  { %845 = vmatprep.subr.bf16.mxu1 %v844_v15 }
  0x89   :  { %815 = vmatpush3.bf16.msra.mxu0 %v814_v21 }
  0x8a   :  { %847 = vmatpush3.bf16.msra.mxu1 %v846_v22  ;;  %817 = vmatprep.subr.bf16.mxu0 %v816_v23 }
  0x8b   :  { %849 = vmatprep.subr.bf16.mxu1 %v848_v27 }
  0x8d   :  { %819 = vmatpush3.bf16.msra.mxu0 %v818_v33 }
  0x8e   :  { %851 = vmatpush3.bf16.msra.mxu1 %v850_v34  ;;  %821 = vmatprep.subr.bf16.mxu0 %v820_v35 }
  0x8f   :  { %853 = vmatprep.subr.bf16.mxu1 %v852_v39 }
  0x91   :  { %823 = vmatpush3.bf16.msra.mxu0 %v822_v46 }
  0x92   :  { %855 = vmatpush3.bf16.msra.mxu1 %v854_v47  ;;  %825 = vmatprep.subr.bf16.mxu0 %v824_v48 }
  0x93   :  { %857 = vmatprep.subr.bf16.mxu1 %v856_v52 }
  0x95   :  { %827 = vmatpush3.bf16.msra.mxu0 %v826_v58 }
  0x96   :  { %859 = vmatpush3.bf16.msra.mxu1 %v858_v59  ;;  %829 = vmatprep.subr.bf16.mxu0 %v828_v60 }
  0x97   :  { %861 = vmatprep.subr.bf16.mxu1 %v860_v61 }
  0x99   :  { %831 = vmatpush3.bf16.msra.mxu0 %v830_v1 }
  0x9a   :  { %863 = vmatpush3.bf16.msra.mxu1 %v862_v3 }
 0x14e   :  { %v199_v4 = vpop.f32.mrb[0].mxu0 }
 0x14f   :  { %299 = vst [vmem:[#allocation9] sm:$0xff] %v199_v4  ;;  %v282_v5 = vpop.f32.mrb[0].mxu1  ;;  %v201_v6 = vpop.f32.mrb[1].mxu0 }
 0x150   :  { %301 = vst [vmem:[#allocation9 + $0x10] sm:$0xff] %v282_v5  ;;  %300 = vst [vmem:[#allocation9 + $0x8] sm:$0xff] %v201_v6  ;;  %v284_v45 = vpop.f32.mrb[1].mxu1  ;;  %442 = vmatprep.mubr.f32.mxu0 %v201_v6 }
 0x151   :  { %302 = vst [vmem:[#allocation9 + $0x18] sm:$0xff] %v284_v45  ;;  %522 = vmatprep.mubr.f32.mxu1 %v284_v45  ;;  %443 = vmatmul.mubr.f32.vlgmr.msra.gmra.mrb[6].mxu0 %v199_v4 }
 0x152   :  { %523 = vmatmul.mubr.f32.vlgmr.msra.gmra.mrb[6].mxu1 %v282_v5  ;;  %v205_v7 = vpop.f32.mrb[2].mxu0 }
 0x153   :  { %303 = vst [vmem:[#allocation9 + $0x20] sm:$0xff] %v205_v7  ;;  %v288_v8 = vpop.f32.mrb[2].mxu1  ;;  %v207_v9 = vpop.f32.mrb[3].mxu0 }
 0x154   :  { %305 = vst [vmem:[#allocation9 + $0x30] sm:$0xff] %v288_v8  ;;  %304 = vst [vmem:[#allocation9 + $0x28] sm:$0xff] %v207_v9  ;;  %v290_v10 = vpop.f32.mrb[3].mxu1  ;;  %447 = vmatprep.mubr.f32.mxu0 %v207_v9 }
 0x155   :  { %306 = vst [vmem:[#allocation9 + $0x38] sm:$0xff] %v290_v10  ;;  %527 = vmatprep.mubr.f32.mxu1 %v290_v10  ;;  %448 = vmatmul.mubr.f32.gmra.mrb[8].mxu0 %v205_v7 }
 0x156   :  { %528 = vmatmul.mubr.f32.gmra.mrb[8].mxu1 %v288_v8  ;;  %v211_v11 = vpop.f32.mrb[4].mxu0 }
 0x157   :  { %307 = vst [vmem:[#allocation9 + $0x40] sm:$0xff] %v211_v11  ;;  %v294_v12 = vpop.f32.mrb[4].mxu1  ;;  %v213_v13 = vpop.f32.mrb[5].mxu0 }
 0x158   :  { %309 = vst [vmem:[#allocation9 + $0x50] sm:$0xff] %v294_v12  ;;  %308 = vst [vmem:[#allocation9 + $0x48] sm:$0xff] %v213_v13  ;;  %v296_v14 = vpop.f32.mrb[5].mxu1  ;;  %452 = vmatprep.mubr.f32.mxu0 %v213_v13 }
 0x159   :  { %310 = vst [vmem:[#allocation9 + $0x58] sm:$0xff] %v296_v14  ;;  %532 = vmatprep.mubr.f32.mxu1 %v296_v14  ;;  %453 = vmatmul.mubr.f32.gmra.mrb[10].mxu0 %v211_v11 }
 0x15a   :  { %533 = vmatmul.mubr.f32.gmra.mrb[10].mxu1 %v294_v12 }
 0x15b   :  { %951 = shalt.err (!%p948_p0)
}
 0x15c   :  { %s952_s5 = scalar_lea.hbm %s1115_s4, 1536 }
 0x15d   :  { %p953_p1 = scmp.ne.s32.totalorder %s1115_s4, %s952_s5  ;;  %p956_p2 = scmp.lt.u32.totalorder %s952_s5, %s1115_s4 }
 0x15f   :  { %p958_p3 = pnand %p956_p2, %p953_p1 }
 0x161   :  { %961 = shalt.err (!%p958_p3)
}
 0x162   :  { %s998_s10 = smov 512   ;;  %s999_s11 = smov 32  }
 0x163   :  { %567 = dma.vmem_to_hbm [thread:$0]  %s562_s25, 1536, %s1115_s4, [#allocation10], %s998_s10, %s998_s10, %s999_s11  }
 0x164   :  { %s1000_s4 = smov [#allocation8]  }
 0x165   :  { %s549_s13 = sshll.u32 %s1000_s4, 4  ;;  %s550_s13 = int_to_ptr.vmem [resolvable:$true] %s549_s13 }
 0x166   :  { %s962_s14 = scalar_lea.vmem %s550_s13, 384  ;;  %p967_p5 = scmp.lt.s32.totalorder %s550_s13, %s550_s13 }
 0x167   :  { %p963_p4 = scmp.ne.s32.totalorder %s550_s13, %s962_s14  ;;  %p968_p6 = scmp.lt.s32.totalorder %s962_s14, %s962_s14 }
 0x169   :  { %p969_p7 = por %p968_p6, %p967_p5 }
 0x16b   :  { %p970_p8 = pnand %p969_p7, %p963_p4 }
 0x224   :  { %v686_v15 = vpop.f32.mrb[6].mxu0 }
 0x225   :  { %v727_v16 = vpop.f32.mrb[6].mxu1  ;;  %v687_v17 = vpop.f32.mrb[7].mxu0 }
 0x226   :  { %v688_v18 = vadd.f32 %v687_v17, %v686_v15  ;;  %v728_v19 = vpop.f32.mrb[7].mxu1 }
 0x227   :  { %v729_v20 = vadd.f32 %v728_v19, %v727_v16 }
 0x228   :  { %v689_v21 = vpop.f32.mrb[8].mxu0 }
 0x229   :  { %v525_v22 = vadd.f32 %v729_v20, %v688_v18  ;;  %v730_v23 = vpop.f32.mrb[8].mxu1  ;;  %v690_v24 = vpop.f32.mrb[9].mxu0 }
 0x22a   :  { %v691_v25 = vadd.f32 %v690_v24, %v689_v21  ;;  %v731_v26 = vpop.f32.mrb[9].mxu1 }
 0x22b   :  { %v732_v27 = vadd.f32 %v731_v26, %v730_v23  ;;  %541 = vst [vmem:[#allocation8] sm:$0xff] %v525_v22 }
 0x22c   :  { %v692_v28 = vpop.f32.mrb[10].mxu0 }
 0x22d   :  { %v530_v29 = vadd.f32 %v732_v27, %v691_v25  ;;  %v733_v30 = vpop.f32.mrb[10].mxu1  ;;  %v693_v31 = vpop.f32.mrb[11].mxu0 }
 0x22e   :  { %v694_v32 = vadd.f32 %v693_v31, %v692_v28  ;;  %v734_v33 = vpop.f32.mrb[11].mxu1 }
 0x22f   :  { %v735_v34 = vadd.f32 %v734_v33, %v733_v30  ;;  %542 = vst [vmem:[#allocation8 + $0x8] sm:$0xff] %v530_v29 }
 0x231   :  { %v535_v35 = vadd.f32 %v735_v34, %v694_v32 }
 0x233   :  { %543 = vst [vmem:[#allocation8 + $0x10] sm:$0xff] %v535_v35 }
 0x234   :  { %973 = shalt.err (!%p970_p8)
}
 0x235   :  { %s974_s17 = scalar_lea.hbm %s1114_s3, 384 }
 0x236   :  { %p975_p9 = scmp.ne.s32.totalorder %s1114_s3, %s974_s17  ;;  %p978_p10 = scmp.lt.u32.totalorder %s974_s17, %s1114_s3 }
 0x238   :  { %p980_p11 = pnand %p978_p10, %p975_p9 }
 0x23a   :  { %983 = shalt.err (!%p980_p11)
}
 0x23b   :  { %555 = dma.vmem_to_hbm [thread:$0]  %s550_s13, 384, %s1114_s3, [#allocation4], %s994_s27, %s994_s27, %s995_s28  }
 0x23c   :  { %988 = dma.done.wait [#allocation4], 384  }
 0x23d   :  { %989 = vsyncadd [#allocation4], 4294966912 }
 0x23e   :  { %990 = dma.done.wait [#allocation10], 1536  }
 0x23f   :  { %991 = vsyncadd [#allocation10], 4294965760 }
 0x240   :  { %574 = vsyncpa [#allocation3], 1 }
 0x241   :  { %575 = vsyncpa [#allocation6], 1 }
 0x242   :  { %576 = vsyncpa [#allocation4], 1 }
 0x243   :  { %577 = vsyncpa [#allocation10], 1 }

</bundles_post_ra>
